<compile_context>
chip_gen: v6e
topology: v6e:2x2x1
jax: 0.10.0
libtpu: 0.0.40
codegen_flags: <defaults>
</compile_context>

<pallas_src>
import math

import jax
import jax.numpy as jnp
from jax.experimental import pallas as pl
from jax.experimental.pallas import tpu as pltpu


# ---------------------------------------------------------------------------
# Kernel: o = sum_k a[k] * h[k], accumulated in f32
# ---------------------------------------------------------------------------
def _combine_kernel(a_ref, h_ref, o_ref):
    # a_ref: [K, C] f32  (VMEM-resident; same block every grid step)
    # h_ref: [K, tr, C]  streaming tile of the (packed) hidden states
    # o_ref: [tr, C]     lane/sublane-dense output tile
    k_total = h_ref.shape[0]
    a = a_ref[...]                                      # [K, C] f32
    acc = h_ref[0].astype(jnp.float32) * a[0:1, :]      # [tr, C] f32
    for k in range(1, k_total):                         # statically unrolled FMA chain
        acc = acc + h_ref[k].astype(jnp.float32) * a[k:k + 1, :]
    o_ref[...] = acc.astype(o_ref.dtype)


# ---------------------------------------------------------------------------
# Tiling helpers
# ---------------------------------------------------------------------------
def _round_up(x, m):
    return ((x + m - 1) // m) * m


def _sublane_pack(itemsize):
    # native sublane packing: 8 rows for 4-byte, 16 for 2-byte, 32 for 1-byte
    return max(8, 32 // itemsize)


def _largest_aligned_divisor(total, align, cap):
    """Largest t <= cap with align | t and t | total. Requires align | total."""
    assert total % align == 0
    if total <= cap:
        return total
    q = total // align
    cap_q = max(1, cap // align)
    best = 1
    i = 1
    while i * i <= q:
        if q % i == 0:
            lo, hi = i, q // i
            if lo <= cap_q and lo > best:
                best = lo
            if hi <= cap_q and hi > best:
                best = hi
        i += 1
    return best * align


def _budgets(max_footprint_bytes=None):
    """(double-buffer footprint budget, vmem_limit_bytes) per TPU generation."""
    try:
        kind = jax.devices()[0].device_kind.lower()
    except Exception:
        kind = ""
    big_vmem = any(t in kind for t in ("v4", "v5", "v6"))   # 128 MiB VMEM parts
    if max_footprint_bytes is None:
        max_footprint_bytes = (64 << 20) if big_vmem else (36 << 20)  # v7x: 64 MiB VMEM
    vmem_limit = (96 << 20) if big_vmem else (48 << 20)
    return max_footprint_bytes, vmem_limit


def _tiled_weighted_sum(alpha_cols, h3, out_dtype, max_footprint_bytes, vmem_limit):
    """alpha_cols: [K, C] f32;  h3: [K, R, C] (R % sublane_pack == 0, C % 128 == 0)."""
    K, R, C = h3.shape
    itemsize = jnp.dtype(h3.dtype).itemsize
    ra = _sublane_pack(itemsize)

    # Padding-aware footprint: tr % ra == 0 and C % 128 == 0, so H and output
    # block sizes are exact (no hidden sublane/lane padding). Both are
    # double-buffered by the BlockSpec pipeline.
    bytes_per_row = 2 * (K + 1) * C * itemsize
    max_rows = max(ra, (max_footprint_bytes // bytes_per_row) // ra * ra)
    if R >= 2 * ra:                              # keep grid >= 2 (pipelining / megacore)
        max_rows = min(max_rows, max(ra, (R // 2) // ra * ra))
    tr = _largest_aligned_divisor(R, ra, max_rows)
    grid = (R // tr,)

    footprint = bytes_per_row * tr + 2 * _round_up(K, 8) * C * 4
    if footprint + (2 << 20) > vmem_limit:
        vmem_limit = min(footprint + (4 << 20), 127 << 20)

    return pl.pallas_call(
        _combine_kernel,
        out_shape=jax.ShapeDtypeStruct((R, C), out_dtype),
        grid=grid,
        in_specs=[
            pl.BlockSpec((K, C), lambda i: (0, 0)),         # alpha (resident)
            pl.BlockSpec((K, tr, C), lambda i: (0, i, 0)),  # H row tiles
        ],
        out_specs=pl.BlockSpec((tr, C), lambda i: (i, 0)),
        compiler_params=pltpu.CompilerParams(
            dimension_semantics=("parallel",),
            vmem_limit_bytes=vmem_limit,
        ),
    )(alpha_cols, h3)


# ---------------------------------------------------------------------------
# Wrapper: Combiner.forward
# ---------------------------------------------------------------------------
def combiner_forward(H, p, combine_style="naive_agg", *, max_footprint_bytes=None):
    """Pallas implementation of Combiner.forward.

    H: [base_number, N, D] array.
    p: [base_number, 1, 1] ('naive_agg') or [base_number, 1, D] ('weighted_agg').
    Returns: [N, D] (same dtype as H).
    """
    K = H.shape[0]
    assert p.shape[0] == K, "p and H must share the base_number axis"
    itemsize = jnp.dtype(H.dtype).itemsize
    ra = _sublane_pack(itemsize)
    max_fp, vmem_limit = _budgets(max_footprint_bytes)

    if combine_style == "naive_agg":
        assert p.shape == (K, 1, 1)
        out_shape = H.shape[1:]
        total = math.prod(out_shape)

        # Lane-dense flat slab: pick a column width C (multiple of 128), pad the
        # flattened extent up to a multiple of ra*C, and view as [K, R, C].
        C = 512
        if total < ra * C:
            C = max(128, _round_up(-(-total // ra), 128))
        total_p = _round_up(total, ra * C)
        h2 = H.reshape(K, total)
        if total_p != total:
            h2 = jnp.pad(h2, ((0, 0), (0, total_p - total)))
        R = total_p // C
        h3 = h2.reshape(K, R, C)

        # Softmax over K scalars, hoisted to the wrapper, computed in f32.
        alpha = jax.nn.softmax(p.reshape(K).astype(jnp.float32), axis=0)
        alpha_cols = jnp.broadcast_to(alpha[:, None], (K, C))

        out = _tiled_weighted_sum(alpha_cols, h3, H.dtype, max_fp, vmem_limit)
        return out.reshape(total_p)[:total].reshape(out_shape)

    elif combine_style == "weighted_agg":
        _, N, D = H.shape
        assert p.shape == (K, 1, D)

        # Softmax over K per hidden channel, f32, hoisted to the wrapper.
        alpha = jax.nn.softmax(p.reshape(K, D).astype(jnp.float32), axis=0)   # [K, D]

        # Lane-pack r rows per lane row so the block column width r*D is a
        # multiple of 128 (unmasked vst, full lane utilization).
        r = 128 // math.gcd(D, 128)
        Cw = r * D
        N_p = _round_up(N, ra * r)
        Hp = H if N_p == N else jnp.pad(H, ((0, 0), (0, N_p - N), (0, 0)))
        R = N_p // r
        h3 = Hp.reshape(K, R, Cw)
        alpha_cols = jnp.tile(alpha, (1, r))                                  # [K, r*D]

        out = _tiled_weighted_sum(alpha_cols, h3, H.dtype, max_fp, vmem_limit)
        return out.reshape(N_p, D)[:N]

    else:
        raise NotImplementedError(
            "Combine style {} is not implemented".format(combine_style))


# ---------------------------------------------------------------------------
# Demo / self-check
# ---------------------------------------------------------------------------
if __name__ == "__main__":
    K, N, D = 4, 8, 32                      # base_number=4, seq=8, hidden_dim=32

    key = jax.random.PRNGKey(0)
    kH, kp1, kp2 = jax.random.split(key, 3)
    H = jax.random.normal(kH, (K, N, D), dtype=jnp.float32)

    # --- naive_agg (module default): p is [base_number, 1, 1] -------------
    p_naive = jax.random.normal(kp1, (K, 1, 1), dtype=jnp.float32)
    out_naive = jax.block_until_ready(combiner_forward(H, p_naive, "naive_agg"))
    ref_naive = jnp.sum(H * jax.nn.softmax(p_naive, axis=0), axis=0)
    assert out_naive.shape == (N, D)
    assert jnp.allclose(out_naive, ref_naive, atol=1e-5, rtol=1e-5), \
        "naive_agg mismatch vs reference"

    # --- weighted_agg: p is [base_number, 1, hidden_dim] ------------------
    p_w = jax.random.normal(kp2, (K, 1, D), dtype=jnp.float32)
    out_w = jax.block_until_ready(combiner_forward(H, p_w, "weighted_agg"))
    ref_w = jnp.sum(H * jax.nn.softmax(p_w, axis=0), axis=0)
    assert out_w.shape == (N, D)
    assert jnp.allclose(out_w, ref_w, atol=1e-5, rtol=1e-5), \
        "weighted_agg mismatch vs reference"

    print("KERNEL_OK")
</pallas_src>

<mosaic_0001>
module attributes {stable_mosaic.version = 11 : i64} {
  func.func @_combine_kernel(%arg0: i32, %arg1: memref<4x128xf32, #tpu.memory_space<vmem>>, %arg2: memref<4x8x128xf32, #tpu.memory_space<vmem>>, %arg3: memref<8x128xf32, #tpu.memory_space<vmem>>) attributes {dimension_semantics = [#tpu.dimension_semantics<parallel>], iteration_bounds = array<i64: 1>, scalar_prefetch = 0 : i64, scratch_operands = 0 : i64, tpu.core_type = #tpu.core_type<tc>, window_params = [{pipeline_mode = #tpu.pipeline_mode<synchronous>, transform_indices = @transform_0, window_bounds = array<i64: 4, 128>}, {transform_indices = @transform_1, window_bounds = array<i64: 4, 8, 128>}, {transform_indices = @transform_2, window_bounds = array<i64: 8, 128>}]} {
    %c0 = arith.constant 0 : index
    %c0_0 = arith.constant 0 : index
    %0 = vector.load %arg1[%c0, %c0_0] : memref<4x128xf32, #tpu.memory_space<vmem>>, vector<4x128xf32>
    %c0_1 = arith.constant 0 : index
    %c0_2 = arith.constant 0 : index
    %c0_3 = arith.constant 0 : index
    %1 = vector.load %arg2[%c0_1, %c0_2, %c0_3] : memref<4x8x128xf32, #tpu.memory_space<vmem>>, vector<1x8x128xf32>
    %2 = vector.shape_cast %1 : vector<1x8x128xf32> to vector<8x128xf32>
    %3 = vector.extract_strided_slice %0 {offsets = [0, 0], sizes = [1, 128], strides = [1, 1]} : vector<4x128xf32> to vector<1x128xf32>
    %4 = vector.broadcast %3 : vector<1x128xf32> to vector<8x128xf32>
    %5 = arith.mulf %2, %4 : vector<8x128xf32>
    %c1 = arith.constant 1 : index
    %c0_4 = arith.constant 0 : index
    %c0_5 = arith.constant 0 : index
    %6 = vector.load %arg2[%c1, %c0_4, %c0_5] : memref<4x8x128xf32, #tpu.memory_space<vmem>>, vector<1x8x128xf32>
    %7 = vector.shape_cast %6 : vector<1x8x128xf32> to vector<8x128xf32>
    %8 = vector.extract_strided_slice %0 {offsets = [1, 0], sizes = [1, 128], strides = [1, 1]} : vector<4x128xf32> to vector<1x128xf32>
    %9 = vector.broadcast %8 : vector<1x128xf32> to vector<8x128xf32>
    %10 = arith.mulf %7, %9 : vector<8x128xf32>
    %11 = arith.addf %5, %10 : vector<8x128xf32>
    %c2 = arith.constant 2 : index
    %c0_6 = arith.constant 0 : index
    %c0_7 = arith.constant 0 : index
    %12 = vector.load %arg2[%c2, %c0_6, %c0_7] : memref<4x8x128xf32, #tpu.memory_space<vmem>>, vector<1x8x128xf32>
    %13 = vector.shape_cast %12 : vector<1x8x128xf32> to vector<8x128xf32>
    %14 = vector.extract_strided_slice %0 {offsets = [2, 0], sizes = [1, 128], strides = [1, 1]} : vector<4x128xf32> to vector<1x128xf32>
    %15 = vector.broadcast %14 : vector<1x128xf32> to vector<8x128xf32>
    %16 = arith.mulf %13, %15 : vector<8x128xf32>
    %17 = arith.addf %11, %16 : vector<8x128xf32>
    %c3 = arith.constant 3 : index
    %c0_8 = arith.constant 0 : index
    %c0_9 = arith.constant 0 : index
    %18 = vector.load %arg2[%c3, %c0_8, %c0_9] : memref<4x8x128xf32, #tpu.memory_space<vmem>>, vector<1x8x128xf32>
    %19 = vector.shape_cast %18 : vector<1x8x128xf32> to vector<8x128xf32>
    %20 = vector.extract_strided_slice %0 {offsets = [3, 0], sizes = [1, 128], strides = [1, 1]} : vector<4x128xf32> to vector<1x128xf32>
    %21 = vector.broadcast %20 : vector<1x128xf32> to vector<8x128xf32>
    %22 = arith.mulf %19, %21 : vector<8x128xf32>
    %23 = arith.addf %17, %22 : vector<8x128xf32>
    %c0_10 = arith.constant 0 : index
    %c0_11 = arith.constant 0 : index
    %24 = vector.load %arg3[%c0_10, %c0_11] : memref<8x128xf32, #tpu.memory_space<vmem>>, vector<8x128xf32>
    tpu.vector_store %arg3[%c0_10, %c0_11], %23 {strides = array<i32>} : memref<8x128xf32, #tpu.memory_space<vmem>>, vector<8x128xf32>,
    return
  }
  func.func @transform_0(%arg0: i32) -> (i32, i32) {
    %c0_i32 = arith.constant 0 : i32
    %c0_i32_0 = arith.constant 0 : i32
    %c0_i32_1 = arith.constant 0 : i32
    return %c0_i32, %c0_i32_0 : i32, i32
  }
  func.func @transform_1(%arg0: i32) -> (i32, i32, i32) {
    %c0_i32 = arith.constant 0 : i32
    %c0_i32_0 = arith.constant 0 : i32
    %c0_i32_1 = arith.constant 0 : i32
    return %c0_i32, %arg0, %c0_i32_0 : i32, i32, i32
  }
  func.func @transform_2(%arg0: i32) -> (i32, i32) {
    %c0_i32 = arith.constant 0 : i32
    %c0_i32_0 = arith.constant 0 : i32
    return %arg0, %c0_i32 : i32, i32
  }
}

</mosaic_0001>

<bundles_post_ra>
// kernel: tpu_custom_call.1
= control target key start
LH: loop header
LB: loop body
LE: loop exit
PB: predicated region body
PF: predicated region fallthrough
CT: control target
= control target key end

     0   :  { %7 = vsyncpa [#allocation3], 0  ;;  %s186_s0 = inlined_call_operand.hbm [shape: f32[4,128], index: 0, kind: input, shape index: {}]   ;;  %s187_s1 = inlined_call_operand.hbm [shape: f32[4,8,128], index: 1, kind: input, shape index: {}]   ;;  %s188_s2 = inlined_call_operand.hbm [shape: f32[8,128], index: 2, kind: output, shape index: {}]  }
   0x1   :  { %8 = vsyncpa [#allocation6], 0 }
   0x2   :  { %9 = vsyncpa [#allocation4], 0  ;;  %s157_s9 = smov [#allocation2]   ;;  %s158_s11 = smov [#allocation5]  }
   0x3   :  { %s16_s10 = sshll.u32 %s157_s9, 4  ;;  %s25_s12 = sshll.u32 %s158_s11, 4  ;;  %s17_s10 = int_to_ptr.vmem [resolvable:$true] %s16_s10  ;;  %s26_s12 = int_to_ptr.vmem [resolvable:$true] %s25_s12 }
   0x4   :  { %s99_s13 = scalar_lea.vmem %s17_s10, 64  ;;  %p104_p1 = scmp.lt.s32.totalorder %s17_s10, %s17_s10 }
   0x5   :  { %p100_p0 = scmp.ne.s32.totalorder %s17_s10, %s99_s13  ;;  %p105_p2 = scmp.lt.s32.totalorder %s99_s13, %s99_s13 }
   0x7   :  { %p106_p3 = por %p105_p2, %p104_p1 }
   0x9   :  { %p107_p4 = pnand %p106_p3, %p100_p0 }
   0xb   :  { %110 = shalt.err (!%p107_p4)
}
   0xc   :  { %19 = dma.hbm_to_vmem [thread:$0]  %s186_s0, 64, %s17_s10, [#allocation3]  }
   0xd   :  { %s119_s16 = scalar_lea.vmem %s26_s12, 512  ;;  %p124_p6 = scmp.lt.s32.totalorder %s26_s12, %s26_s12 }
   0xe   :  { %p120_p5 = scmp.ne.s32.totalorder %s26_s12, %s119_s16  ;;  %p125_p7 = scmp.lt.s32.totalorder %s119_s16, %s119_s16 }
  0x10   :  { %p126_p8 = por %p125_p7, %p124_p6 }
  0x12   :  { %p127_p9 = pnand %p126_p8, %p120_p5 }
  0x14   :  { %130 = shalt.err (!%p127_p9)
}
  0x15   :  { %s159_s17 = smov 128   ;;  %s160_s18 = smov 8  }
  0x16   :  { %31 = dma.hbm_to_vmem [thread:$0]  %s187_s1, 512, %s26_s12, [#allocation6], %s159_s17, %s159_s17, %s160_s18  }
  0x17   :  { %151 = dma.done.wait [#allocation3], 64  }
  0x18   :  { %152 = vsyncadd [#allocation3], 4294967232 }
  0x19   :  { %153 = dma.done.wait [#allocation6], 512  }
  0x1a   :  { %154 = vsyncadd [#allocation6], 4294966784  ;;  %v40_v0 = vlaneseq  ;;  %v38_v6 = vld [vmem:[#allocation2] sm:$0xf]  ;;  %v39_v7 = vld [vmem:[#allocation5] sm:$0xff]  ;;  %s161_s0 = smov [#allocation7]  }
  0x1b   :  { %v46_v8 = vld [vmem:[#allocation5 + $0x8] sm:$0xff]  ;;  %v54_v11 = vld [vmem:[#allocation5 + $0x10] sm:$0xff]  ;;  %v62_v14 = vld [vmem:[#allocation5 + $0x18] sm:$0xff]  ;;  %s76_s1 = sshll.u32 %s161_s0, 4  ;;  %s77_s1 = int_to_ptr.vmem [resolvable:$true] %s76_s1 }
  0x1c   :  { %v41_v1 = vshrl.u32 %v40_v0, 7  ;;  %s131_s21 = scalar_lea.vmem %s77_s1, 128  ;;  %p136_p11 = scmp.lt.s32.totalorder %s77_s1, %s77_s1 }
  0x1d   :  { %p132_p10 = scmp.ne.s32.totalorder %s77_s1, %s131_s21  ;;  %p137_p12 = scmp.lt.s32.totalorder %s131_s21, %s131_s21 }
  0x1e   :  { %v42_v2 = vsub.s32 0, %v41_v1  ;;  %v49_v3 = vsub.s32 1, %v41_v1  ;;  %v57_v4 = vsub.s32 2, %v41_v1  ;;  %v65_v5 = vsub.s32 3, %v41_v1 }
  0x1f   :  { %p138_p13 = por %p137_p12, %p136_p11 }
  0x20   :  { %v43_v9 = vrot.slane %v38_v6, %v42_v2  ;;  %v50_v10 = vrot.slane %v38_v6, %v49_v3  ;;  %v58_v12 = vrot.slane %v38_v6, %v57_v4  ;;  %v66_v13 = vrot.slane %v38_v6, %v65_v5 }
  0x21   :  { %p139_p0 = pnand %p138_p13, %p132_p10 }
  0x22   :  { %v44_v15 = vmul.f32 %v43_v9, %v39_v7  ;;  %v51_v16 = vmul.f32 %v50_v10, %v46_v8  ;;  %v59_v17 = vmul.f32 %v58_v12, %v54_v11  ;;  %v67_v19 = vmul.f32 %v66_v13, %v62_v14 }
  0x24   :  { %v52_v18 = vadd.f32 %v51_v16, %v44_v15 }
  0x26   :  { %v60_v20 = vadd.f32 %v59_v17, %v52_v18 }
  0x28   :  { %v68_v21 = vadd.f32 %v67_v19, %v60_v20 }
  0x2a   :  { %69 = vst [vmem:[#allocation7] sm:$0xff] %v68_v21 }
  0x2b   :  { %142 = shalt.err (!%p139_p0)
}
  0x2c   :  { %79 = dma.vmem_to_hbm [thread:$0]  %s77_s1, 128, %s188_s2, [#allocation4]  }
  0x2d   :  { %155 = dma.done.wait [#allocation4], 128  }
  0x2e   :  { %156 = vsyncadd [#allocation4], 4294967168 }
  0x2f   :  { %83 = vsyncpa [#allocation3], 1 }
  0x30   :  { %84 = vsyncpa [#allocation6], 1 }
  0x31   :  { %85 = vsyncpa [#allocation4], 1 }

</bundles_post_ra>
